<compile_context>
chip_gen: v6e
topology: v6e:2x2x1
jax: 0.10.0
libtpu: 0.0.40
codegen_flags: <defaults>
</compile_context>

<pallas_src>
import functools

import jax
import jax.numpy as jnp
from jax import lax
from jax.experimental import pallas as pl
from jax.experimental.pallas import tpu as pltpu


def _supcon_occ_kernel(q_ref, k_ref, labr_ref, labc_ref, sidr_ref, sidc_ref,
                       o_ref, m_ref, d_ref, sps_ref, sp_ref, *, inv_temp):
    """One (row-block qi, col-block ki) step of the streamed SupCon-OCC loss.

    pos_ij  = [label_i == label_j] & [i != j]
    keep_ij = [i != j] & ([label_i != label_j] | [sample_i == sample_j])
    """
    qi = pl.program_id(0)
    ki = pl.program_id(1)
    nk = pl.num_programs(1)
    tq = q_ref.shape[0]
    tk = k_ref.shape[0]

    @pl.when(ki == 0)
    def _init():
        m_ref[...] = jnp.full_like(m_ref, -jnp.inf)
        d_ref[...] = jnp.zeros_like(d_ref)
        sps_ref[...] = jnp.zeros_like(sps_ref)
        sp_ref[...] = jnp.zeros_like(sp_ref)

    # Fold 1/temperature into the (tq, D) anchor operand: O(tq*D) instead of an
    # O(tq*tk) rescale of the score tile.
    q = q_ref[...] * inv_temp
    # Contract the last (lane) dim of both operands -> q @ k.T on the MXU without
    # materializing a transposed copy of k.
    scores = lax.dot_general(q, k_ref[...], (((1,), (1,)), ((), ())),
                             preferred_element_type=jnp.float32)        # (tq, tk)

    # Boolean masks: two compares + two selects (no f32 mask matrices).
    same_label = labr_ref[...] == labc_ref[...]                         # (tq, tk)
    same_sample = sidr_ref[...] == sidc_ref[...]                        # (tq, tk)
    ri = qi * tq + lax.broadcasted_iota(jnp.int32, (tq, 1), 0)
    ci = ki * tk + lax.broadcasted_iota(jnp.int32, (1, tk), 1)
    off_diag = ri != ci                                                 # (tq, tk)
    pos = jnp.logical_and(same_label, off_diag)
    keep = jnp.logical_and(
        off_diag, jnp.logical_or(jnp.logical_not(same_label), same_sample))

    # Online row-max + rescaled masked denominator (streaming over ki).
    m_prev = m_ref[...]
    m_new = jnp.maximum(m_prev, jnp.max(scores, axis=1, keepdims=True))
    alpha = jnp.exp(m_prev - m_new)
    e = jnp.where(keep, jnp.exp(scores - m_new), 0.0)
    d_ref[...] = alpha * d_ref[...] + jnp.sum(e, axis=1, keepdims=True)
    sps_ref[...] += jnp.sum(jnp.where(pos, scores, 0.0), axis=1, keepdims=True)
    sp_ref[...] += jnp.sum(pos.astype(jnp.float32), axis=1, keepdims=True)
    m_ref[...] = m_new

    @pl.when(ki == nk - 1)
    def _finalize():
        den = sp_ref[...]
        mlpp = (sps_ref[...] / jnp.maximum(den, 1.0)
                - m_ref[...] - jnp.log(d_ref[...]))
        # Rows with no positives would be NaN in the PyTorch reference; emit 0 there.
        o_ref[...] = jnp.where(den > 0.0, -mlpp, 0.0)


def _pick_block(n, quantum, target):
    """Largest multiple of `quantum` that divides `n` and is <= target; else n (full)."""
    t = min(target, n)
    t -= t % quantum
    while t >= quantum:
        if n % t == 0:
            return t
        t -= quantum
    return n


def supcon_loss_occ(features, labels=None, mask=None, *, temperature=0.07,
                    contrast_mode="all", base_temperature=0.07,
                    block_q=None, block_k=None, matmul_dtype=None):
    """Pallas implementation of SupConLossOCC.forward (contrast_mode='all')."""
    if features.ndim < 3:
        raise ValueError("`features` needs to be [bsz, n_views, ...]")
    if mask is not None:
        # TODO(synk): arbitrary user-supplied contrast mask not supported (only the
        # labels path and the labels=None SimCLR/eye path).
        raise NotImplementedError("explicit `mask` is not supported")
    if contrast_mode != "all":
        # TODO(synk): contrast_mode='one' (anchor set != contrast set) not implemented.
        raise NotImplementedError("only contrast_mode='all' is implemented")

    bsz, n_views = features.shape[0], features.shape[1]
    feats = features.reshape(bsz, n_views, -1)
    D = feats.shape[-1]
    N = bsz * n_views

    if labels is None:
        # labels=None & mask=None -> mask = eye(bsz); distinct labels reproduce it.
        labels = jnp.arange(bsz, dtype=jnp.int32)
    labels = labels.reshape(-1).astype(jnp.int32)
    if labels.shape[0] != bsz:
        raise ValueError("Num of labels does not match num of features")

    # Batch-major flattening (free reshape; no HBM transpose copy).  The loss is
    # invariant to simultaneously permuting the anchor==contrast rows, so this is
    # equivalent to torch's view-major cat(unbind(features, 1)) ordering.
    cf = feats.reshape(N, D).astype(jnp.float32)

    # Zero-pad feature dim to a lane-dense multiple of 128 (does not change dots).
    Dp = max(128, ((D + 127) // 128) * 128)
    if Dp != D:
        cf = jnp.pad(cf, ((0, 0), (0, Dp - D)))
    if matmul_dtype is not None:
        # Optional bf16 MXU operands (v6e/v7x); accumulation stays f32 in-kernel.
        cf = cf.astype(matmul_dtype)

    lab_rows = jnp.repeat(labels, n_views)                               # (N,)
    sid_rows = jnp.repeat(jnp.arange(bsz, dtype=jnp.int32), n_views)     # (N,)
    lab_r = lab_rows.reshape(N, 1)
    lab_c = lab_rows.reshape(1, N)
    sid_r = sid_rows.reshape(N, 1)
    sid_c = sid_rows.reshape(1, N)

    # Tile selection: keep blocks modest so double-buffered q/k tiles fit scoped VMEM.
    if block_q is None:
        tq_target = 256
        while tq_target > 8 and tq_target * Dp * 4 > 4 * 2**20:
            tq_target //= 2
        tq = _pick_block(N, 8, tq_target)
    else:
        tq = int(block_q)
    if block_k is None:
        tk_target = 256
        while tk_target > 128 and tk_target * Dp * 4 > 4 * 2**20:
            tk_target //= 2
        tk = _pick_block(N, 128, tk_target)
    else:
        tk = int(block_k)
    if N % tq or N % tk:
        raise ValueError("block sizes must divide bsz * n_views")

    vmem_limit = int(min(48 * 2**20, max(32 * 2**20, 8 * (tq + tk) * Dp * 4)))

    kernel = functools.partial(_supcon_occ_kernel, inv_temp=1.0 / float(temperature))
    # NOTE: base_temperature is unused by the reference torch forward (kept for parity).

    per_row = pl.pallas_call(
        kernel,
        out_shape=jax.ShapeDtypeStruct((N, 1), jnp.float32),
        grid=(N // tq, N // tk),
        in_specs=[
            pl.BlockSpec((tq, Dp), lambda qi, ki: (qi, 0)),   # anchor rows (resident over ki)
            pl.BlockSpec((tk, Dp), lambda qi, ki: (ki, 0)),   # contrast rows (streamed)
            pl.BlockSpec((tq, 1), lambda qi, ki: (qi, 0)),    # row labels   (int32)
            pl.BlockSpec((1, tk), lambda qi, ki: (0, ki)),    # col labels   (int32)
            pl.BlockSpec((tq, 1), lambda qi, ki: (qi, 0)),    # row sample ids
            pl.BlockSpec((1, tk), lambda qi, ki: (0, ki)),    # col sample ids
        ],
        out_specs=pl.BlockSpec((tq, 1), lambda qi, ki: (qi, 0)),
        scratch_shapes=[pltpu.VMEM((tq, 1), jnp.float32)] * 4,   # m, d, sum(pos*s), sum(pos)
        compiler_params=pltpu.CompilerParams(
            dimension_semantics=("parallel", "arbitrary"),
            vmem_limit_bytes=vmem_limit,
        ),
    )(cf, cf, lab_r, lab_c, sid_r, sid_c)

    # loss.view(anchor_count, bsz).mean() == mean over all N anchors.
    return jnp.mean(per_row)


def _reference_supcon_occ(features, labels, temperature=0.07):
    """Pure-JAX port of the PyTorch forward (view-major ordering), for verification."""
    bsz, n_views = features.shape[0], features.shape[1]
    feats = features.reshape(bsz, n_views, -1).astype(jnp.float32)
    N = bsz * n_views
    mask = (labels.reshape(-1, 1) == labels.reshape(1, -1)).astype(jnp.float32)
    cf = jnp.concatenate([feats[:, v] for v in range(n_views)], axis=0)
    adc = jnp.dot(cf, cf.T) / temperature
    logits = adc - jnp.max(adc, axis=1, keepdims=True)
    neg_mask = mask - jnp.eye(bsz, dtype=jnp.float32)
    mask_t = jnp.tile(mask, (n_views, n_views))
    neg_t = jnp.tile(neg_mask, (n_views, n_views))
    logits_mask = 1.0 - jnp.eye(N, dtype=jnp.float32)
    mask_t = mask_t * logits_mask
    exp_logits = jnp.exp(logits) * logits_mask
    filtered = exp_logits - neg_t * exp_logits
    log_prob = logits - jnp.log(jnp.sum(filtered, axis=1, keepdims=True))
    mlpp = jnp.sum(mask_t * log_prob, axis=1) / jnp.sum(mask_t, axis=1)
    return jnp.mean(-mlpp)


if __name__ == "__main__":
    key = jax.random.PRNGKey(0)
    k1, k2, k3, k4 = jax.random.split(key, 4)

    # Case 1: tiny shapes (single-tile grid).
    bsz, n_views, dim = 8, 2, 32
    f1 = jax.random.normal(k1, (bsz, n_views, dim), dtype=jnp.float32)
    f1 = f1 / jnp.linalg.norm(f1, axis=-1, keepdims=True)
    l1 = jax.random.randint(k2, (bsz,), 0, 3)
    loss1 = jax.block_until_ready(supcon_loss_occ(f1, l1))
    ref1 = _reference_supcon_occ(f1, l1)
    assert jnp.allclose(loss1, ref1, rtol=2e-4, atol=2e-4), (loss1, ref1)

    # Case 2: multi-tile grid (N=256, blocks 128x128 -> grid (2,2)) exercising the
    # streamed online-max path and the parallel row-block axis.
    bsz, n_views, dim = 128, 2, 48
    f2 = jax.random.normal(k3, (bsz, n_views, dim), dtype=jnp.float32)
    f2 = f2 / jnp.linalg.norm(f2, axis=-1, keepdims=True)
    l2 = jax.random.randint(k4, (bsz,), 0, 4)
    loss2 = jax.block_until_ready(supcon_loss_occ(f2, l2, block_q=128, block_k=128))
    ref2 = _reference_supcon_occ(f2, l2)
    assert jnp.allclose(loss2, ref2, rtol=2e-4, atol=2e-4), (loss2, ref2)

    print("KERNEL_OK")
</pallas_src>

<mosaic_0001>
module attributes {stable_mosaic.version = 11 : i64} {
  func.func @_supcon_occ_kernel(%arg0: i32, %arg1: i32, %arg2: memref<16x128xf32, #tpu.memory_space<vmem>>, %arg3: memref<16x128xf32, #tpu.memory_space<vmem>>, %arg4: memref<16x1xi32, #tpu.memory_space<vmem>>, %arg5: memref<1x16xi32, #tpu.memory_space<vmem>>, %arg6: memref<16x1xi32, #tpu.memory_space<vmem>>, %arg7: memref<1x16xi32, #tpu.memory_space<vmem>>, %arg8: memref<16x1xf32, #tpu.memory_space<vmem>>, %arg9: memref<16x1xf32, #tpu.memory_space<vmem>>, %arg10: memref<16x1xf32, #tpu.memory_space<vmem>>, %arg11: memref<16x1xf32, #tpu.memory_space<vmem>>, %arg12: memref<16x1xf32, #tpu.memory_space<vmem>>) attributes {dimension_semantics = [#tpu.dimension_semantics<parallel>, #tpu.dimension_semantics<arbitrary>], iteration_bounds = array<i64: 1, 1>, scalar_prefetch = 0 : i64, scratch_operands = 4 : i64, tpu.core_type = #tpu.core_type<tc>, window_params = [{transform_indices = @transform_0, window_bounds = array<i64: 16, 128>}, {transform_indices = @transform_1, window_bounds = array<i64: 16, 128>}, {transform_indices = @transform_2, window_bounds = array<i64: 16, 1>}, {transform_indices = @transform_3, window_bounds = array<i64: 1, 16>}, {transform_indices = @transform_4, window_bounds = array<i64: 16, 1>}, {transform_indices = @transform_5, window_bounds = array<i64: 1, 16>}, {transform_indices = @transform_6, window_bounds = array<i64: 16, 1>}]} {
    %c0_i32 = arith.constant 0 : i32
    %0 = arith.cmpi eq, %arg1, %c0_i32 : i32
    %1 = arith.extui %0 : i1 to i32
    %c0_i32_0 = arith.constant 0 : i32
    %2 = arith.cmpi ne, %1, %c0_i32_0 : i32
    scf.if %2 {
      %cst_39 = arith.constant 0xFF800000 : f32
      %68 = vector.broadcast %cst_39 : f32 to vector<16x1xf32>
      %c0_40 = arith.constant 0 : index
      %c0_41 = arith.constant 0 : index
      %69 = vector.load %arg9[%c0_40, %c0_41] : memref<16x1xf32, #tpu.memory_space<vmem>>, vector<16x1xf32>
      tpu.vector_store %arg9[%c0_40, %c0_41], %68 {strides = array<i32>} : memref<16x1xf32, #tpu.memory_space<vmem>>, vector<16x1xf32>,
      %cst_42 = arith.constant 0.000000e+00 : f32
      %70 = vector.broadcast %cst_42 : f32 to vector<16x1xf32>
      %c0_43 = arith.constant 0 : index
      %c0_44 = arith.constant 0 : index
      %71 = vector.load %arg10[%c0_43, %c0_44] : memref<16x1xf32, #tpu.memory_space<vmem>>, vector<16x1xf32>
      tpu.vector_store %arg10[%c0_43, %c0_44], %70 {strides = array<i32>} : memref<16x1xf32, #tpu.memory_space<vmem>>, vector<16x1xf32>,
      %cst_45 = arith.constant 0.000000e+00 : f32
      %72 = vector.broadcast %cst_45 : f32 to vector<16x1xf32>
      %c0_46 = arith.constant 0 : index
      %c0_47 = arith.constant 0 : index
      %73 = vector.load %arg11[%c0_46, %c0_47] : memref<16x1xf32, #tpu.memory_space<vmem>>, vector<16x1xf32>
      tpu.vector_store %arg11[%c0_46, %c0_47], %72 {strides = array<i32>} : memref<16x1xf32, #tpu.memory_space<vmem>>, vector<16x1xf32>,
      %cst_48 = arith.constant 0.000000e+00 : f32
      %74 = vector.broadcast %cst_48 : f32 to vector<16x1xf32>
      %c0_49 = arith.constant 0 : index
      %c0_50 = arith.constant 0 : index
      %75 = vector.load %arg12[%c0_49, %c0_50] : memref<16x1xf32, #tpu.memory_space<vmem>>, vector<16x1xf32>
      tpu.vector_store %arg12[%c0_49, %c0_50], %74 {strides = array<i32>} : memref<16x1xf32, #tpu.memory_space<vmem>>, vector<16x1xf32>,
    } else {
    }
    %c0 = arith.constant 0 : index
    %c0_1 = arith.constant 0 : index
    %3 = vector.load %arg2[%c0, %c0_1] : memref<16x128xf32, #tpu.memory_space<vmem>>, vector<16x128xf32>
    %cst = arith.constant 14.2857141 : f32
    %4 = vector.broadcast %cst : f32 to vector<16x128xf32>
    %5 = arith.mulf %3, %4 : vector<16x128xf32>
    %c0_2 = arith.constant 0 : index
    %c0_3 = arith.constant 0 : index
    %6 = vector.load %arg3[%c0_2, %c0_3] : memref<16x128xf32, #tpu.memory_space<vmem>>, vector<16x128xf32>
    %cst_4 = arith.constant dense<0.000000e+00> : vector<16x16xf32>
    %7 = tpu.matmul %5, %6, %cst_4 {dimension_numbers = #tpu.dot_dimension_numbers<[1], [1], [0], [0], [0, 0, 1, 0], [], []>} : vector<16x128xf32>, vector<16x128xf32>, vector<16x16xf32> -> vector<16x16xf32>
    %c0_5 = arith.constant 0 : index
    %c0_6 = arith.constant 0 : index
    %8 = vector.load %arg4[%c0_5, %c0_6] : memref<16x1xi32, #tpu.memory_space<vmem>>, vector<16x1xi32>
    %c0_7 = arith.constant 0 : index
    %c0_8 = arith.constant 0 : index
    %9 = vector.load %arg5[%c0_7, %c0_8] : memref<1x16xi32, #tpu.memory_space<vmem>>, vector<1x16xi32>
    %10 = vector.broadcast %8 : vector<16x1xi32> to vector<16x16xi32>
    %11 = vector.broadcast %9 : vector<1x16xi32> to vector<16x16xi32>
    %12 = arith.cmpi eq, %10, %11 : vector<16x16xi32>
    %c0_9 = arith.constant 0 : index
    %c0_10 = arith.constant 0 : index
    %13 = vector.load %arg6[%c0_9, %c0_10] : memref<16x1xi32, #tpu.memory_space<vmem>>, vector<16x1xi32>
    %c0_11 = arith.constant 0 : index
    %c0_12 = arith.constant 0 : index
    %14 = vector.load %arg7[%c0_11, %c0_12] : memref<1x16xi32, #tpu.memory_space<vmem>>, vector<1x16xi32>
    %15 = vector.broadcast %13 : vector<16x1xi32> to vector<16x16xi32>
    %16 = vector.broadcast %14 : vector<1x16xi32> to vector<16x16xi32>
    %17 = arith.cmpi eq, %15, %16 : vector<16x16xi32>
    %c16_i32 = arith.constant 16 : i32
    %18 = arith.muli %arg0, %c16_i32 : i32
    %19 = tpu.iota {dimensions = array<i32: 0>} : vector<16x1xi32>
    %20 = vector.broadcast %18 : i32 to vector<16x1xi32>
    %21 = arith.addi %20, %19 : vector<16x1xi32>
    %c16_i32_13 = arith.constant 16 : i32
    %22 = arith.muli %arg1, %c16_i32_13 : i32
    %23 = tpu.iota {dimensions = array<i32: 1>} : vector<1x16xi32>
    %24 = vector.broadcast %22 : i32 to vector<1x16xi32>
    %25 = arith.addi %24, %23 : vector<1x16xi32>
    %26 = vector.broadcast %21 : vector<16x1xi32> to vector<16x16xi32>
    %27 = vector.broadcast %25 : vector<1x16xi32> to vector<16x16xi32>
    %28 = arith.cmpi ne, %26, %27 : vector<16x16xi32>
    %29 = arith.andi %12, %28 : vector<16x16xi1>
    %cst_14 = arith.constant dense<true> : vector<16x16xi1>
    %30 = arith.xori %12, %cst_14 : vector<16x16xi1>
    %31 = arith.ori %30, %17 : vector<16x16xi1>
    %32 = arith.andi %28, %31 : vector<16x16xi1>
    %c0_15 = arith.constant 0 : index
    %c0_16 = arith.constant 0 : index
    %33 = vector.load %arg9[%c0_15, %c0_16] : memref<16x1xf32, #tpu.memory_space<vmem>>, vector<16x1xf32>
    %cst_17 = arith.constant dense<0xFF800000> : vector<16xf32>
    %34 = vector.multi_reduction <maximumf>, %7, %cst_17 [1] : vector<16x16xf32> to vector<16xf32>
    %35 = vector.shape_cast %34 : vector<16xf32> to vector<16x1xf32>
    %36 = arith.maximumf %33, %35 : vector<16x1xf32>
    %37 = arith.subf %33, %36 : vector<16x1xf32>
    %38 = math.exp %37 : vector<16x1xf32>
    %39 = vector.broadcast %36 : vector<16x1xf32> to vector<16x16xf32>
    %40 = arith.subf %7, %39 : vector<16x16xf32>
    %41 = math.exp %40 : vector<16x16xf32>
    %cst_18 = arith.constant 0.000000e+00 : f32
    %42 = vector.broadcast %cst_18 : f32 to vector<16x16xf32>
    %43 = arith.select %32, %41, %42 : vector<16x16xi1>, vector<16x16xf32>
    %c0_19 = arith.constant 0 : index
    %c0_20 = arith.constant 0 : index
    %44 = vector.load %arg10[%c0_19, %c0_20] : memref<16x1xf32, #tpu.memory_space<vmem>>, vector<16x1xf32>
    %45 = arith.mulf %38, %44 : vector<16x1xf32>
    %cst_21 = arith.constant dense<0.000000e+00> : vector<16xf32>
    %46 = vector.multi_reduction <add>, %43, %cst_21 [1] : vector<16x16xf32> to vector<16xf32>
    %47 = vector.shape_cast %46 : vector<16xf32> to vector<16x1xf32>
    %48 = arith.addf %45, %47 : vector<16x1xf32>
    %c0_22 = arith.constant 0 : index
    %c0_23 = arith.constant 0 : index
    %49 = vector.load %arg10[%c0_22, %c0_23] : memref<16x1xf32, #tpu.memory_space<vmem>>, vector<16x1xf32>
    tpu.vector_store %arg10[%c0_22, %c0_23], %48 {strides = array<i32>} : memref<16x1xf32, #tpu.memory_space<vmem>>, vector<16x1xf32>,
    %c0_24 = arith.constant 0 : index
    %c0_25 = arith.constant 0 : index
    %50 = vector.load %arg11[%c0_24, %c0_25] : memref<16x1xf32, #tpu.memory_space<vmem>>, vector<16x1xf32>
    %cst_26 = arith.constant 0.000000e+00 : f32
    %51 = vector.broadcast %cst_26 : f32 to vector<16x16xf32>
    %52 = arith.select %29, %7, %51 : vector<16x16xi1>, vector<16x16xf32>
    %cst_27 = arith.constant dense<0.000000e+00> : vector<16xf32>
    %53 = vector.multi_reduction <add>, %52, %cst_27 [1] : vector<16x16xf32> to vector<16xf32>
    %54 = vector.shape_cast %53 : vector<16xf32> to vector<16x1xf32>
    %55 = arith.addf %50, %54 : vector<16x1xf32>
    %c0_28 = arith.constant 0 : index
    %c0_29 = arith.constant 0 : index
    %56 = vector.load %arg11[%c0_28, %c0_29] : memref<16x1xf32, #tpu.memory_space<vmem>>, vector<16x1xf32>
    tpu.vector_store %arg11[%c0_28, %c0_29], %55 {strides = array<i32>} : memref<16x1xf32, #tpu.memory_space<vmem>>, vector<16x1xf32>,
    %c0_30 = arith.constant 0 : index
    %c0_31 = arith.constant 0 : index
    %57 = vector.load %arg12[%c0_30, %c0_31] : memref<16x1xf32, #tpu.memory_space<vmem>>, vector<16x1xf32>
    %58 = arith.extui %29 : vector<16x16xi1> to vector<16x16xi32>
    %59 = arith.sitofp %58 : vector<16x16xi32> to vector<16x16xf32>
    %cst_32 = arith.constant dense<0.000000e+00> : vector<16xf32>
    %60 = vector.multi_reduction <add>, %59, %cst_32 [1] : vector<16x16xf32> to vector<16xf32>
    %61 = vector.shape_cast %60 : vector<16xf32> to vector<16x1xf32>
    %62 = arith.addf %57, %61 : vector<16x1xf32>
    %c0_33 = arith.constant 0 : index
    %c0_34 = arith.constant 0 : index
    %63 = vector.load %arg12[%c0_33, %c0_34] : memref<16x1xf32, #tpu.memory_space<vmem>>, vector<16x1xf32>
    tpu.vector_store %arg12[%c0_33, %c0_34], %62 {strides = array<i32>} : memref<16x1xf32, #tpu.memory_space<vmem>>, vector<16x1xf32>,
    %c0_35 = arith.constant 0 : index
    %c0_36 = arith.constant 0 : index
    %64 = vector.load %arg9[%c0_35, %c0_36] : memref<16x1xf32, #tpu.memory_space<vmem>>, vector<16x1xf32>
    tpu.vector_store %arg9[%c0_35, %c0_36], %36 {strides = array<i32>} : memref<16x1xf32, #tpu.memory_space<vmem>>, vector<16x1xf32>,
    %c0_i32_37 = arith.constant 0 : i32
    %65 = arith.cmpi eq, %arg1, %c0_i32_37 : i32
    %66 = arith.extui %65 : i1 to i32
    %c0_i32_38 = arith.constant 0 : i32
    %67 = arith.cmpi ne, %66, %c0_i32_38 : i32
    scf.if %67 {
      %c0_39 = arith.constant 0 : index
      %c0_40 = arith.constant 0 : index
      %68 = vector.load %arg12[%c0_39, %c0_40] : memref<16x1xf32, #tpu.memory_space<vmem>>, vector<16x1xf32>
      %c0_41 = arith.constant 0 : index
      %c0_42 = arith.constant 0 : index
      %69 = vector.load %arg11[%c0_41, %c0_42] : memref<16x1xf32, #tpu.memory_space<vmem>>, vector<16x1xf32>
      %cst_43 = arith.constant 1.000000e+00 : f32
      %70 = vector.broadcast %cst_43 : f32 to vector<16x1xf32>
      %71 = arith.maximumf %68, %70 : vector<16x1xf32>
      %72 = arith.divf %69, %71 : vector<16x1xf32>
      %c0_44 = arith.constant 0 : index
      %c0_45 = arith.constant 0 : index
      %73 = vector.load %arg9[%c0_44, %c0_45] : memref<16x1xf32, #tpu.memory_space<vmem>>, vector<16x1xf32>
      %74 = arith.subf %72, %73 : vector<16x1xf32>
      %c0_46 = arith.constant 0 : index
      %c0_47 = arith.constant 0 : index
      %75 = vector.load %arg10[%c0_46, %c0_47] : memref<16x1xf32, #tpu.memory_space<vmem>>, vector<16x1xf32>
      %76 = math.log %75 : vector<16x1xf32>
      %77 = arith.subf %74, %76 : vector<16x1xf32>
      %cst_48 = arith.constant 0.000000e+00 : f32
      %78 = vector.broadcast %cst_48 : f32 to vector<16x1xf32>
      %79 = arith.cmpf ogt, %68, %78 : vector<16x1xf32>
      %cst_49 = arith.constant 0.000000e+00 : f32
      %80 = vector.broadcast %cst_49 : f32 to vector<16x1xf32>
      %81 = arith.subf %80, %77 : vector<16x1xf32>
      %cst_50 = arith.constant 0.000000e+00 : f32
      %82 = vector.broadcast %cst_50 : f32 to vector<16x1xf32>
      %83 = arith.select %79, %81, %82 : vector<16x1xi1>, vector<16x1xf32>
      %c0_51 = arith.constant 0 : index
      %c0_52 = arith.constant 0 : index
      %84 = vector.load %arg8[%c0_51, %c0_52] : memref<16x1xf32, #tpu.memory_space<vmem>>, vector<16x1xf32>
      tpu.vector_store %arg8[%c0_51, %c0_52], %83 {strides = array<i32>} : memref<16x1xf32, #tpu.memory_space<vmem>>, vector<16x1xf32>,
    } else {
    }
    return
  }
  func.func @transform_0(%arg0: i32, %arg1: i32) -> (i32, i32) {
    %c0_i32 = arith.constant 0 : i32
    %c0_i32_0 = arith.constant 0 : i32
    return %arg0, %c0_i32 : i32, i32
  }
  func.func @transform_1(%arg0: i32, %arg1: i32) -> (i32, i32) {
    %c0_i32 = arith.constant 0 : i32
    %c0_i32_0 = arith.constant 0 : i32
    return %arg1, %c0_i32 : i32, i32
  }
  func.func @transform_2(%arg0: i32, %arg1: i32) -> (i32, i32) {
    %c0_i32 = arith.constant 0 : i32
    %c0_i32_0 = arith.constant 0 : i32
    return %arg0, %c0_i32 : i32, i32
  }
  func.func @transform_3(%arg0: i32, %arg1: i32) -> (i32, i32) {
    %c0_i32 = arith.constant 0 : i32
    %c0_i32_0 = arith.constant 0 : i32
    return %c0_i32, %arg1 : i32, i32
  }
  func.func @transform_4(%arg0: i32, %arg1: i32) -> (i32, i32) {
    %c0_i32 = arith.constant 0 : i32
    %c0_i32_0 = arith.constant 0 : i32
    return %arg0, %c0_i32 : i32, i32
  }
  func.func @transform_5(%arg0: i32, %arg1: i32) -> (i32, i32) {
    %c0_i32 = arith.constant 0 : i32
    %c0_i32_0 = arith.constant 0 : i32
    return %c0_i32, %arg1 : i32, i32
  }
  func.func @transform_6(%arg0: i32, %arg1: i32) -> (i32, i32) {
    %c0_i32 = arith.constant 0 : i32
    %c0_i32_0 = arith.constant 0 : i32
    return %arg0, %c0_i32 : i32, i32
  }
}

</mosaic_0001>

<bundles_post_ra>
// kernel: tpu_custom_call.1
= control target key start
LH: loop header
LB: loop body
LE: loop exit
PB: predicated region body
PF: predicated region fallthrough
CT: control target
= control target key end

     0   :  { %v325_v6 = vmov 0   ;;  %vm27_vm0 = vcmask 7168   ;;  %v326_v7 = vmov -inf   ;;  %vm171_vm1 = vcmask 130048   ;;  %s482_s1 = inlined_call_operand.vmem [shape: f32[16,128], index: 1, kind: input, shape index: {}]   ;;  %s483_s0 = inlined_call_operand.vmem [shape: f32[16,128], index: 0, kind: input, shape index: {}]   ;;  %s484_s2 = inlined_call_operand.vmem [shape: s32[16,1], index: 2, kind: input, shape index: {}]   ;;  %s485_s4 = inlined_call_operand.vmem [shape: s32[16,1], index: 4, kind: input, shape index: {}]   ;;  %s486_s3 = inlined_call_operand.vmem [shape: s32[1,16], index: 3, kind: input, shape index: {}]   ;;  %s487_s5 = inlined_call_operand.vmem [shape: s32[1,16], index: 5, kind: input, shape index: {}]   ;;  %s488_s6 = inlined_call_operand.vmem [shape: f32[16,1], index: 6, kind: output, shape index: {}]  }
   0x1   :  { %v41_v0 = vld [vmem:[%s482_s1 + $0x8] sm:$0xff]  ;;  %v40_v1 = vld [vmem:[%s482_s1] sm:$0xff]  ;;  %308 = vset.pattern.permute.xlu0 %v325_v6  ;;  %307 = vset.pattern.permute.xlu1 %v325_v6  ;;  %28 = vst.msk [vmem:[#allocation2] sm:$0xff] %vm27_vm0, %v326_v7  ;;  %29 = vst.msk [vmem:[#allocation2 + $0x8] sm:$0xff] %vm27_vm0, %v326_v7  ;;  %v327_v13 = vmov 0.0   ;;  %v148_v25 = vlaneseq  ;;  %vm328_vm8 = vmmov 1  }
   0x2   :  { %v36_v2 = vld [vmem:[%s483_s0] sm:$0xff]  ;;  %296 = vmatprep.subr.mxu0 %v41_v0  ;;  %v37_v4 = vld [vmem:[%s483_s0 + $0x8] sm:$0xff]  ;;  %30 = vst.msk [vmem:[#allocation3] sm:$0xff] %vm27_vm0, %v327_v13  ;;  %31 = vst.msk [vmem:[#allocation3 + $0x8] sm:$0xff] %vm27_vm0, %v327_v13 }
   0x3   :  { %v38_v3 = vmul.f32 14.285714, %v36_v2  ;;  %297 = vmatpush3.xpose.msra.mxu0 %v41_v0  ;;  %v39_v5 = vmul.f32 14.285714, %v37_v4  ;;  %v117_v12 = vld [vmem:[%s484_s2] sm:$0xff]  ;;  %32 = vst.msk [vmem:[#allocation4] sm:$0xff] %vm27_vm0, %v327_v13 }
   0x4   :  { %298 = vmatprep.subr.mxu0 %v40_v1  ;;  %33 = vst.msk [vmem:[#allocation4 + $0x8] sm:$0xff] %vm27_vm0, %v327_v13  ;;  %34 = vst.msk [vmem:[#allocation5] sm:$0xff] %vm27_vm0, %v327_v13  ;;  %v118_v22 = vld [vmem:[%s484_s2 + $0x8] sm:$0xff]  ;;  %v132_v23 = vld [vmem:[%s485_s4] sm:$0xff]  ;;  %v149_v26 = vshrl.u32 %v148_v25, 7  ;;  %v156_v27 = vand.u32 127, %v148_v25 }
   0x5   :  { %300 = vmatprep.mubr.f32.mxu0 %v38_v3  ;;  %35 = vst.msk [vmem:[#allocation5 + $0x8] sm:$0xff] %vm27_vm0, %v327_v13  ;;  %v133_v24 = vld [vmem:[%s485_s4 + $0x8] sm:$0xff]  ;;  %v288_v28 = vld [vmem:[%s486_s3] ss:$0 sm:$0xff] }
   0x6   :  { %vm159_vm2 = vcmp.ne.s32.totalorder %v149_v26, %v156_v27  ;;  %v150_v36 = vadd.s32 8, %v149_v26  ;;  %v289_v42 = vld [vmem:[%s487_s5] ss:$0 sm:$0xff] }
   0x7   :  { %299 = vmatpush3.xpose.msra.mxu0 %v40_v1 }
   0x8   :  { %v395_v14 = vld [vmem:[#allocation2] sm:$0xff]  ;;  %v400_v17 = vld [vmem:[#allocation2 + $0x8] sm:$0xff]  ;;  %vm160_vm5 = vcmp.ne.s32.totalorder %v150_v36, %v156_v27 }
   0x9   :  { %v204_v2 = vld [vmem:[#allocation3] sm:$0xff]  ;;  %v205_v7 = vld [vmem:[#allocation3 + $0x8] sm:$0xff] }
   0xa   :  { %301 = vmatmul.mubr.f32.vlgmr.msra.gmra.mxu0 %v39_v5 }
   0xb   :  { %v233_v57 = vld [vmem:[#allocation5] sm:$0xff] }
   0xc   :  { %v234_v62 = vld [vmem:[#allocation5 + $0x8] sm:$0xff] }
  0xca   :  { %v378_v8 = vpop.f32.mrf.mxu0 }
  0xcb   :  { %v175_v11 = vsel %vm171_vm1, %v378_v8, -inf }
  0xcc   :  { %v380_v9 = vpop.f32.mrf.mxu0 }
  0xcd   :  { %v172_v10 = vsel %vm171_vm1, %v380_v9, -inf }
  0xce   :  { %173 = vmax.xlane.f32.xlu0 %v172_v10 }
  0xd2   :  { %176 = vmax.xlane.f32.xlu0 %v175_v11 }
  0xe8   :  { %121 = vperm.xlu0 %308, %v117_v12  }
 0x157   :  { %v174_v15 = vpop.xlane.xlu0 %173 }
 0x158   :  { %v398_v16 = vmax.f32 %v395_v14, %v174_v15  ;;  %v219_v15 = vld [vmem:[#allocation4] sm:$0xff] }
 0x15a   :  { %v180_v18 = vsub.f32 %v395_v14, %v398_v16  ;;  %249 = vst.msk [vmem:[#allocation2] sm:$0xff] %vm27_vm0, %v398_v16  ;;  %188 = vperm.xlu1 %307, %v398_v16  }
 0x15b   :  { %v177_v19 = vpop.xlane.xlu0 %176 }
 0x15c   :  { %v408_v20 = vmax.f32 %v400_v17, %v177_v19  ;;  %v182_v60 = vmul.f32 1.442695, %v180_v18  ;;  %v220_v19 = vld [vmem:[#allocation4 + $0x8] sm:$0xff] }
 0x15e   :  { %v181_v21 = vsub.f32 %v400_v17, %v408_v20  ;;  %250 = vst.msk [vmem:[#allocation2 + $0x8] sm:$0xff] %vm27_vm0, %v408_v20  ;;  %193 = vperm.xlu1 %307, %v408_v20  }
 0x160   :  { %v184_v61 = vmul.f32 1.442695, %v181_v21 }
 0x162   :  { %124 = vperm.xlu1 %307, %v118_v22  }
 0x163   :  { %v122_v29 = vpop.permute.xlu0 %121 }
 0x164   :  { %vm130_vm3 = vcmp.eq.s32.totalorder %v122_v29, %v288_v28  ;;  %v264_v29 = vld [vmem:[#allocation2] sm:$0xff] }
 0x165   :  { %vm429_vm4 = vmand %vm130_vm3, %vm159_vm2 }
 0x166   :  { %136 = vperm.xlu1 %307, %v132_v23   ;;  %v290_v31 = vsel %vm429_vm4, 1.0, %v327_v13  ;;  %vm163_vm9 = vmxor %vm130_vm3, %vm328_vm8  ;;  %v221_v53 = vsel %vm429_vm4, %v380_v9, 0.0 }
 0x167   :  { %v239_v32 = vsel %vm171_vm1, %v290_v31, 0.0  ;;  %v223_v54 = vsel %vm171_vm1, %v221_v53, 0.0 }
 0x16a   :  { %139 = vperm.xlu1 %307, %v133_v24  }
 0x18e   :  { %240 = vadd.xlane.f32.xlu1 %v239_v32 }
 0x1d5   :  { %v189_v33 = vpop.permute.xlu1 %188 }
 0x1d6   :  { %v196_v34 = vsub.f32 %v380_v9, %v189_v33 }
 0x1d8   :  { %v198_v35 = vmul.f32 1.442695, %v196_v34 }
 0x1d9   :  { %v194_v37 = vpop.permute.xlu1 %193 }
 0x1da   :  { %309 = vpow2.f32 %v198_v35  ;;  %v197_v38 = vsub.f32 %v378_v8, %v194_v37  ;;  %v265_v35 = vld [vmem:[#allocation2 + $0x8] sm:$0xff] }
 0x1dc   :  { %v200_v39 = vmul.f32 1.442695, %v197_v38 }
 0x1dd   :  { %v125_v40 = vpop.permute.xlu1 %124 }
 0x1de   :  { %311 = vpow2.f32 %v200_v39  ;;  %vm131_vm6 = vcmp.eq.s32.totalorder %v125_v40, %v288_v28 }
 0x1df   :  { %vm439_vm7 = vmand %vm131_vm6, %vm160_vm5  ;;  %313 = vpow2.f32 %v182_v60 }
 0x1e0   :  { %v291_v43 = vsel %vm439_vm7, 1.0, %v327_v13  ;;  %vm164_vm12 = vmxor %vm131_vm6, %vm328_vm8  ;;  %v222_v55 = vsel %vm439_vm7, %v378_v8, 0.0  ;;  %315 = vpow2.f32 %v184_v61 }
 0x1e1   :  { %v137_v44 = vpop.permute.xlu1 %136  ;;  %v242_v45 = vsel %vm171_vm1, %v291_v43, 0.0  ;;  %v226_v56 = vsel %vm171_vm1, %v222_v55, 0.0 }
 0x1e2   :  { %vm145_vm10 = vcmp.eq.s32.totalorder %v137_v44, %v289_v42  ;;  %243 = vadd.xlane.f32.xlu0 %v242_v45 }
 0x1e3   :  { %vm165_vm11 = vmor %vm163_vm9, %vm145_vm10 }
 0x1e4   :  { %vm167_vm14 = vmand %vm159_vm2, %vm165_vm11 }
 0x1e5   :  { %v140_v46 = vpop.permute.xlu1 %139 }
 0x1e6   :  { %vm146_vm13 = vcmp.eq.s32.totalorder %v140_v46, %v289_v42 }
 0x1e7   :  { %v310_v47 = vpop.eup %309  ;;  %vm166_vm15 = vmor %vm164_vm12, %vm146_vm13 }
 0x1e8   :  { %v202_v48 = vsel %vm167_vm14, %v310_v47, 0.0  ;;  %vm168_vm3 = vmand %vm160_vm5, %vm166_vm15 }
 0x1e9   :  { %v208_v49 = vsel %vm171_vm1, %v202_v48, 0.0 }
 0x1ea   :  { %209 = vadd.xlane.f32.xlu1 %v208_v49 }
 0x1eb   :  { %v312_v50 = vpop.eup %311 }
 0x1ec   :  { %v203_v51 = vsel %vm168_vm3, %v312_v50, 0.0  ;;  %v314_v1 = vpop.eup %313 }
 0x1ed   :  { %v211_v52 = vsel %vm171_vm1, %v203_v51, 0.0  ;;  %v206_v4 = vmul.f32 %v314_v1, %v204_v2  ;;  %v316_v5 = vpop.eup %315 }
 0x1ee   :  { %212 = vadd.xlane.f32.xlu1 %v211_v52  ;;  %v207_v11 = vmul.f32 %v316_v5, %v205_v7 }
 0x1f2   :  { %224 = vadd.xlane.f32.xlu1 %v223_v54 }
 0x1f6   :  { %227 = vadd.xlane.f32.xlu1 %v226_v56 }
 0x217   :  { %v241_v58 = vpop.xlane.xlu1 %240 }
 0x218   :  { %v245_v59 = vadd.f32 %v241_v58, %v233_v57 }
 0x21a   :  { %247 = vst.msk [vmem:[#allocation5] sm:$0xff] %vm27_vm0, %v245_v59 }
 0x221   :  { %v254_v3 = vld [vmem:[#allocation5] sm:$0xff] }
 0x222   :  { %v258_v8 = vmax.f32 %v254_v3, 1.0  ;;  %vm276_vm1 = vcmp.gt.f32.partialorder %v254_v3, 0.0 }
 0x224   :  { %317 = vrcp.f32 %v258_v8 }
 0x231   :  { %v318_v23 = vpop.eup %317 }
 0x26b   :  { %v244_v63 = vpop.xlane.xlu0 %243 }
 0x26c   :  { %v246_v0 = vadd.f32 %v244_v63, %v234_v62 }
 0x26e   :  { %248 = vst.msk [vmem:[#allocation5 + $0x8] sm:$0xff] %vm27_vm0, %v246_v0 }
 0x273   :  { %v210_v6 = vpop.xlane.xlu1 %209 }
 0x274   :  { %v214_v9 = vadd.f32 %v210_v6, %v206_v4 }
 0x275   :  { %v255_v10 = vld [vmem:[#allocation5 + $0x8] sm:$0xff] }
 0x276   :  { %217 = vst.msk [vmem:[#allocation3] sm:$0xff] %vm27_vm0, %v214_v9  ;;  %v259_v14 = vmax.f32 %v255_v10, 1.0  ;;  %vm277_vm2 = vcmp.gt.f32.partialorder %v255_v10, 0.0 }
 0x277   :  { %v213_v12 = vpop.xlane.xlu1 %212 }
 0x278   :  { %v215_v13 = vadd.f32 %v213_v12, %v207_v11  ;;  %319 = vrcp.f32 %v259_v14 }
 0x27a   :  { %218 = vst.msk [vmem:[#allocation3 + $0x8] sm:$0xff] %vm27_vm0, %v215_v13 }
 0x27b   :  { %v225_v16 = vpop.xlane.xlu1 %224 }
 0x27c   :  { %v229_v17 = vadd.f32 %v225_v16, %v219_v15 }
 0x27d   :  { %v268_v18 = vld [vmem:[#allocation3] sm:$0xff] }
 0x27e   :  { %321 = vlog2.f32 %v268_v18  ;;  %231 = vst.msk [vmem:[#allocation4] sm:$0xff] %vm27_vm0, %v229_v17 }
 0x27f   :  { %v228_v20 = vpop.xlane.xlu1 %227 }
 0x280   :  { %v230_v21 = vadd.f32 %v228_v20, %v220_v19 }
 0x281   :  { %v269_v22 = vld [vmem:[#allocation3 + $0x8] sm:$0xff] }
 0x282   :  { %323 = vlog2.f32 %v269_v22  ;;  %232 = vst.msk [vmem:[#allocation4 + $0x8] sm:$0xff] %vm27_vm0, %v230_v21 }
 0x285   :  { %v256_v24 = vld [vmem:[#allocation4] sm:$0xff]  ;;  %v320_v27 = vpop.eup %319 }
 0x286   :  { %v261_v25 = vmul.f32 %v318_v23, %v256_v24 }
 0x288   :  { %v266_v31 = vsub.f32 %v261_v25, %v264_v29 }
 0x289   :  { %v257_v26 = vld [vmem:[#allocation4 + $0x8] sm:$0xff] }
 0x28a   :  { %v263_v32 = vmul.f32 %v320_v27, %v257_v26 }
 0x28b   :  { %v322_v28 = vpop.eup %321 }
 0x28c   :  { %v271_v30 = vmul.f32 0.6931472, %v322_v28  ;;  %v267_v38 = vsub.f32 %v263_v32, %v265_v35 }
 0x28e   :  { %v274_v33 = vsub.f32 %v266_v31, %v271_v30 }
 0x28f   :  { %v324_v34 = vpop.eup %323 }
 0x290   :  { %v273_v36 = vmul.f32 0.6931472, %v324_v34  ;;  %v278_v37 = vsub.f32 0.0, %v274_v33 }
 0x292   :  { %v280_v39 = vsel %vm276_vm1, %v278_v37, 0.0  ;;  %v275_v40 = vsub.f32 %v267_v38, %v273_v36 }
 0x293   :  { %282 = vst.msk [vmem:[%s488_s6] sm:$0xff] %vm27_vm0, %v280_v39 }
 0x294   :  { %v279_v41 = vsub.f32 0.0, %v275_v40 }
 0x296   :  { %v281_v42 = vsel %vm277_vm2, %v279_v41, 0.0 }
 0x297   :  { %283 = vst.msk [vmem:[%s488_s6 + $0x8] sm:$0xff] %vm27_vm0, %v281_v42 }

</bundles_post_ra>
